<compile_context>
chip_gen: v6e
topology: v6e:2x2x1
jax: 0.10.0
libtpu: 0.0.40
codegen_flags: <defaults>
</compile_context>

<pallas_src>
import functools

import jax
import jax.numpy as jnp
from jax import lax
from jax.experimental import pallas as pl
from jax.experimental.pallas import tpu as pltpu

_LANE = 128


def _round_up(x, m):
    return (x + m - 1) // m * m


def _cdiv(a, b):
    return -(-a // b)


def _fold_bn(gamma, beta, mean, var, eps=1e-5):
    scale = gamma / jnp.sqrt(var + eps)
    shift = beta - mean * scale
    return scale, shift


def _pad2d(a, rows, cols):
    return jnp.pad(a, ((0, rows - a.shape[0]), (0, cols - a.shape[1])))


# --------------------------------------------------------------------------
# Kernel: one batch tile.
#   refs = (x_cat, x_cont, emb_fold, W0_cont, b0, W1, b1, ..., WL, bL, out)
# Layer 0 = multi-hot(x_cat) @ emb_fold  +  x_cont @ W0_cont  + b0, then ReLU.
# Remaining layers are plain (folded) Linear (+ReLU except last).
# --------------------------------------------------------------------------
def _tabular_kernel(n_cat, total_ni, num_rest,
                    x_cat_ref, x_cont_ref, emb_ref, w0c_ref, b0_ref, *refs):
    out_ref = refs[-1]
    wb = refs[:-1]

    idx = x_cat_ref[...]                                  # (TILE_B, n_cat) int32
    tb = idx.shape[0]

    # multi-hot over the concatenated (offset) vocabulary; groups are disjoint
    iota = lax.broadcasted_iota(jnp.int32, (tb, total_ni), 1)
    mh = jnp.zeros((tb, total_ni), jnp.float32)
    for c in range(n_cat):
        mh = mh + (idx[:, c:c + 1] == iota).astype(jnp.float32)

    # layer 0: folded-embedding matmul (compute dtype) + f32 continuous matmul
    h = jnp.dot(mh.astype(emb_ref.dtype), emb_ref[...],
                preferred_element_type=jnp.float32)
    h = h + jnp.dot(x_cont_ref[...], w0c_ref[...],
                    preferred_element_type=jnp.float32)
    h = h + b0_ref[...]
    h = jnp.maximum(h, 0.0)

    for li in range(num_rest):
        W = wb[2 * li][...]
        b = wb[2 * li + 1][...]
        h = jnp.dot(h.astype(W.dtype), W, preferred_element_type=jnp.float32) + b
        if li < num_rest - 1:
            h = jnp.maximum(h, 0.0)                       # ReLU (BN folded)

    out_ref[...] = h.astype(out_ref.dtype)


# --------------------------------------------------------------------------
# Wrapper: parameter folding + tiled pallas_call
# --------------------------------------------------------------------------
def tabular_forward(x_cat, x_cont, params, *, tile_b=1024,
                    compute_dtype=jnp.bfloat16, eps=1e-5):
    """Eval-mode TabularModel forward (BN uses running stats, dropout=identity)."""
    emb_tables = params["emb_tables"]
    hidden = params["hidden"]
    Wf_raw, bf_raw = params["final"]

    B, n_cat = x_cat.shape
    n_cont = x_cont.shape[1]
    nis = [int(t.shape[0]) for t in emb_tables]
    nfs = [int(t.shape[1]) for t in emb_tables]
    n_emb = sum(nfs)
    total_ni = sum(nis)

    # ---- fold every embedding table through the first Linear layer ----
    W0 = hidden[0][0].astype(jnp.float32)                 # (n_emb + n_cont, h0)
    b0 = hidden[0][1].astype(jnp.float32)
    blocks, fo = [], 0
    for tbl, nf in zip(emb_tables, nfs):
        blocks.append(tbl.astype(jnp.float32) @ W0[fo:fo + nf, :])
        fo += nf
    emb_fold = jnp.concatenate(blocks, axis=0)            # (total_ni, h0)

    # ---- fold bn_cont (eval mode) into the continuous rows of layer 0 ----
    cs, ct = _fold_bn(*params["bn_cont"], eps=eps)
    W0_cont = W0[n_emb:, :]
    W0c = cs[:, None] * W0_cont
    b0 = b0 + ct @ W0_cont

    # ---- fold hidden BNs into the following Linear layers ----
    rest_W, rest_b = [], []
    for li in range(1, len(hidden)):
        W = hidden[li][0].astype(jnp.float32)
        b = hidden[li][1].astype(jnp.float32)
        s, t = _fold_bn(*hidden[li - 1][2], eps=eps)
        rest_W.append(s[:, None] * W)
        rest_b.append(b + t @ W)
    s, t = _fold_bn(*hidden[-1][2], eps=eps)
    Wf = Wf_raw.astype(jnp.float32)
    bf = bf_raw.astype(jnp.float32)
    rest_W.append(s[:, None] * Wf)
    rest_b.append(bf + t @ Wf)
    num_rest = len(rest_W)

    # ---- pad only hidden widths to lane multiples; inputs/output unpadded ----
    h_dims = [W0.shape[1]] + [W.shape[1] for W in rest_W[:-1]]
    h_pads = [_round_up(h, _LANE) for h in h_dims]
    out_sz = rest_W[-1].shape[1]

    emb_fold_p = _pad2d(emb_fold, total_ni, h_pads[0]).astype(compute_dtype)
    W0c_p = _pad2d(W0c, n_cont, h_pads[0]).astype(jnp.float32)   # keep f32
    b0_p = _pad2d(b0.reshape(1, -1), 1, h_pads[0]).astype(jnp.float32)

    rest_W_p, rest_b_p = [], []
    for li in range(num_rest):
        kp = h_pads[li]
        np_ = h_pads[li + 1] if li < num_rest - 1 else out_sz    # final unpadded
        wdt = compute_dtype if li < num_rest - 1 else jnp.float32
        rest_W_p.append(_pad2d(rest_W[li], kp, np_).astype(wdt))
        rest_b_p.append(_pad2d(rest_b[li].reshape(1, -1), 1, np_)
                        .astype(jnp.float32))

    # ---- batch tiling: big tiles, but >= 2 grid steps when batch permits ----
    sub = 16 if jnp.dtype(compute_dtype) == jnp.dtype(jnp.bfloat16) else 8
    B_ceil = _round_up(B, sub)
    TILE_B = min(max(sub, _round_up(tile_b, sub)), B_ceil)
    steps = _cdiv(B_ceil, TILE_B)
    if steps == 1 and B_ceil >= 2 * sub:
        steps = 2                                   # let megacore shard the batch
    TILE_B = _round_up(_cdiv(B_ceil, steps), sub)
    B_pad = TILE_B * steps
    grid = (steps,)

    # ---- kernel inputs (no feature padding, no XLA-side gather) ----
    offs = []
    acc = 0
    for ni in nis:
        offs.append(acc)
        acc += ni
    x_cat_off = x_cat.astype(jnp.int32) + jnp.asarray(offs, jnp.int32)[None, :]
    x_cat_off = jnp.pad(x_cat_off, ((0, B_pad - B), (0, 0)))
    x_cont_in = jnp.pad(x_cont.astype(jnp.float32), ((0, B_pad - B), (0, 0)))

    args = [x_cat_off, x_cont_in, emb_fold_p, W0c_p, b0_p]
    for W, b in zip(rest_W_p, rest_b_p):
        args += [W, b]

    # ---- cost estimate + generation-aware VMEM budget ----
    param_bytes = int(emb_fold_p.size) * emb_fold_p.dtype.itemsize \
        + int(W0c_p.size) * 4 + int(b0_p.size) * 4 \
        + sum(int(W.size) * W.dtype.itemsize + int(b.size) * 4
              for W, b in zip(rest_W_p, rest_b_p))
    flops = 2 * B_pad * (total_ni + n_cont) * h_pads[0]
    for li in range(num_rest):
        np_ = h_pads[li + 1] if li < num_rest - 1 else out_sz
        flops += 2 * B_pad * h_pads[li] * np_
    bytes_accessed = (int(x_cat_off.size) * 4 + int(x_cont_in.size) * 4
                      + param_bytes + B_pad * out_sz * 4)

    max_w = max(h_pads + [out_sz, total_ni])
    vmem_need = (2 * TILE_B * (n_cat + n_cont) * 4      # double-buffered inputs
                 + 2 * TILE_B * out_sz * 4              # double-buffered output
                 + 2 * param_bytes                      # conservative (fallback = 2 bufs)
                 + 4 * TILE_B * max_w * 4)              # intermediate activations
    try:
        phys = int(getattr(pltpu.get_tpu_info(), "vmem_capacity_bytes", 0)) \
            or (64 << 20)
    except Exception:
        phys = 64 << 20
    vmem_limit = int(min(max(int(1.25 * vmem_need), 16 << 20), int(0.85 * phys)))

    kernel = functools.partial(_tabular_kernel, n_cat, total_ni, num_rest)

    def _make_call(weight_pipeline_mode):
        def const_spec(shape):
            if weight_pipeline_mode is None:
                return pl.BlockSpec(shape, lambda i: (0, 0))
            return pl.BlockSpec(shape, lambda i: (0, 0),
                                pipeline_mode=weight_pipeline_mode)

        in_specs = [
            pl.BlockSpec((TILE_B, n_cat), lambda i: (i, 0)),     # indices (int32)
            pl.BlockSpec((TILE_B, n_cont), lambda i: (i, 0)),    # continuous (f32)
            const_spec(emb_fold_p.shape),
            const_spec(W0c_p.shape),
            const_spec(b0_p.shape),
        ]
        for W, b in zip(rest_W_p, rest_b_p):
            in_specs.append(const_spec(W.shape))
            in_specs.append(const_spec(b.shape))
        out_specs = pl.BlockSpec((TILE_B, out_sz), lambda i: (i, 0))

        return pl.pallas_call(
            kernel,
            out_shape=jax.ShapeDtypeStruct((B_pad, out_sz), jnp.float32),
            grid=grid,
            in_specs=in_specs,
            out_specs=out_specs,
            compiler_params=pltpu.CompilerParams(
                dimension_semantics=("parallel",),
                vmem_limit_bytes=vmem_limit,
            ),
            cost_estimate=pl.CostEstimate(
                flops=int(flops), transcendentals=0,
                bytes_accessed=int(bytes_accessed)),
        )

    # Weights/biases have constant index_maps -> request single buffering to
    # halve resident-parameter VMEM (important on v7x); fall back cleanly if
    # this Pallas version rejects pipeline_mode=Buffered(1).
    try:
        out_padded = _make_call(pl.Buffered(1))(*args)
    except Exception:
        out_padded = _make_call(None)(*args)

    return out_padded[:B, :]


# --------------------------------------------------------------------------
# Pure-JAX reference (eval-mode PyTorch semantics) for validation
# --------------------------------------------------------------------------
def _reference_forward(x_cat, x_cont, params, eps=1e-5):
    hp = jax.lax.Precision.HIGHEST
    embs = [tbl[x_cat[:, i]] for i, tbl in enumerate(params["emb_tables"])]
    x = jnp.concatenate(embs, axis=1)
    g, b_, m, v = params["bn_cont"]
    xc = (x_cont - m) / jnp.sqrt(v + eps) * g + b_
    x = jnp.concatenate([x, xc], axis=1)
    for (W, b, (g, b_, m, v)) in params["hidden"]:
        x = jnp.maximum(jnp.dot(x, W, precision=hp) + b, 0.0)
        x = (x - m) / jnp.sqrt(v + eps) * g + b_
    Wf, bf = params["final"]
    return jnp.dot(x, Wf, precision=hp) + bf


def init_params(key, emb_sz, n_cont, out_sz, layers):
    keys = iter(jax.random.split(key, 64))
    emb_tables = [
        0.1 * jax.random.normal(next(keys), (ni, nf), jnp.float32)
        for ni, nf in emb_sz
    ]
    n_emb = sum(nf for _, nf in emb_sz)
    n_in = n_emb + n_cont

    def bn_params(n):
        gamma = 1.0 + 0.05 * jax.random.normal(next(keys), (n,), jnp.float32)
        beta = 0.05 * jax.random.normal(next(keys), (n,), jnp.float32)
        mean = 0.1 * jax.random.normal(next(keys), (n,), jnp.float32)
        var = 1.0 + 0.1 * jax.random.uniform(next(keys), (n,), jnp.float32)
        return (gamma, beta, mean, var)

    bn_cont = bn_params(n_cont)

    hidden = []
    for h in layers:
        W = 0.1 * jax.random.normal(next(keys), (n_in, h), jnp.float32)
        b = 0.05 * jax.random.normal(next(keys), (h,), jnp.float32)
        hidden.append((W, b, bn_params(h)))
        n_in = h

    Wf = 0.1 * jax.random.normal(next(keys), (n_in, out_sz), jnp.float32)
    bf = 0.05 * jax.random.normal(next(keys), (out_sz,), jnp.float32)

    return {
        "emb_tables": emb_tables,
        "bn_cont": bn_cont,
        "hidden": hidden,
        "final": (Wf, bf),
    }


if __name__ == "__main__":
    # Small config: emb_sz = [(10,4), (8,3), (6,2)] -> n_emb=9, n_cont=5,
    # layers=[32,16], out_sz=2, batch=8.
    emb_sz = [(10, 4), (8, 3), (6, 2)]
    n_cont = 5
    out_sz = 2
    layers = [32, 16]
    B = 8

    key = jax.random.PRNGKey(0)
    kp, kc1, kc2, kc3, kx = jax.random.split(key, 5)
    params = init_params(kp, emb_sz, n_cont, out_sz, layers)

    x_cat = jnp.stack(
        [
            jax.random.randint(kc1, (B,), 0, emb_sz[0][0]),
            jax.random.randint(kc2, (B,), 0, emb_sz[1][0]),
            jax.random.randint(kc3, (B,), 0, emb_sz[2][0]),
        ],
        axis=1,
    ).astype(jnp.int32)
    x_cont = jax.random.normal(kx, (B, n_cont), jnp.float32)

    ref = _reference_forward(x_cat, x_cont, params)

    # exact (f32) path — tight tolerance
    out_f32 = tabular_forward(x_cat, x_cont, params, compute_dtype=jnp.float32)
    out_f32 = jax.block_until_ready(out_f32)
    assert out_f32.shape == (B, out_sz), out_f32.shape
    assert jnp.allclose(out_f32, ref, atol=2e-3, rtol=2e-3), (out_f32, ref)

    # default (bf16 compute, f32 accumulation) path — bf16-appropriate tolerance
    out_bf16 = tabular_forward(x_cat, x_cont, params)
    out_bf16 = jax.block_until_ready(out_bf16)
    assert out_bf16.shape == (B, out_sz), out_bf16.shape
    assert jnp.allclose(out_bf16, ref, atol=3e-2, rtol=3e-2), (out_bf16, ref)

    print("KERNEL_OK")
</pallas_src>

<mosaic_0001>
module attributes {stable_mosaic.version = 11 : i64} {
  func.func @_tabular_kernel(%arg0: i32, %arg1: memref<8x3xi32, #tpu.memory_space<vmem>>, %arg2: memref<8x5xf32, #tpu.memory_space<vmem>>, %arg3: memref<24x128xf32, #tpu.memory_space<vmem>>, %arg4: memref<5x128xf32, #tpu.memory_space<vmem>>, %arg5: memref<1x128xf32, #tpu.memory_space<vmem>>, %arg6: memref<128x128xf32, #tpu.memory_space<vmem>>, %arg7: memref<1x128xf32, #tpu.memory_space<vmem>>, %arg8: memref<128x2xf32, #tpu.memory_space<vmem>>, %arg9: memref<1x2xf32, #tpu.memory_space<vmem>>, %arg10: memref<8x2xf32, #tpu.memory_space<vmem>>) attributes {dimension_semantics = [#tpu.dimension_semantics<parallel>], iteration_bounds = array<i64: 1>, scalar_prefetch = 0 : i64, scratch_operands = 0 : i64, tpu.core_type = #tpu.core_type<tc>, window_params = [{transform_indices = @transform_0, window_bounds = array<i64: 8, 3>}, {transform_indices = @transform_1, window_bounds = array<i64: 8, 5>}, {pipeline_mode = #tpu.pipeline_mode<synchronous>, transform_indices = @transform_2, window_bounds = array<i64: 24, 128>}, {pipeline_mode = #tpu.pipeline_mode<synchronous>, transform_indices = @transform_3, window_bounds = array<i64: 5, 128>}, {pipeline_mode = #tpu.pipeline_mode<synchronous>, transform_indices = @transform_4, window_bounds = array<i64: 1, 128>}, {pipeline_mode = #tpu.pipeline_mode<synchronous>, transform_indices = @transform_5, window_bounds = array<i64: 128, 128>}, {pipeline_mode = #tpu.pipeline_mode<synchronous>, transform_indices = @transform_6, window_bounds = array<i64: 1, 128>}, {pipeline_mode = #tpu.pipeline_mode<synchronous>, transform_indices = @transform_7, window_bounds = array<i64: 128, 2>}, {pipeline_mode = #tpu.pipeline_mode<synchronous>, transform_indices = @transform_8, window_bounds = array<i64: 1, 2>}, {transform_indices = @transform_9, window_bounds = array<i64: 8, 2>}]} {
    %c0 = arith.constant 0 : index
    %c0_0 = arith.constant 0 : index
    %0 = vector.load %arg1[%c0, %c0_0] : memref<8x3xi32, #tpu.memory_space<vmem>>, vector<8x3xi32>
    %1 = tpu.iota {dimensions = array<i32: 1>} : vector<8x24xi32>
    %cst = arith.constant 0.000000e+00 : f32
    %2 = vector.broadcast %cst : f32 to vector<8x24xf32>
    %3 = vector.extract_strided_slice %0 {offsets = [0, 0], sizes = [8, 1], strides = [1, 1]} : vector<8x3xi32> to vector<8x1xi32>
    %4 = vector.broadcast %3 : vector<8x1xi32> to vector<8x24xi32>
    %5 = arith.cmpi eq, %4, %1 : vector<8x24xi32>
    %6 = arith.extui %5 : vector<8x24xi1> to vector<8x24xi32>
    %7 = arith.sitofp %6 : vector<8x24xi32> to vector<8x24xf32>
    %8 = arith.addf %2, %7 : vector<8x24xf32>
    %9 = vector.extract_strided_slice %0 {offsets = [0, 1], sizes = [8, 1], strides = [1, 1]} : vector<8x3xi32> to vector<8x1xi32>
    %10 = vector.broadcast %9 : vector<8x1xi32> to vector<8x24xi32>
    %11 = arith.cmpi eq, %10, %1 : vector<8x24xi32>
    %12 = arith.extui %11 : vector<8x24xi1> to vector<8x24xi32>
    %13 = arith.sitofp %12 : vector<8x24xi32> to vector<8x24xf32>
    %14 = arith.addf %8, %13 : vector<8x24xf32>
    %15 = vector.extract_strided_slice %0 {offsets = [0, 2], sizes = [8, 1], strides = [1, 1]} : vector<8x3xi32> to vector<8x1xi32>
    %16 = vector.broadcast %15 : vector<8x1xi32> to vector<8x24xi32>
    %17 = arith.cmpi eq, %16, %1 : vector<8x24xi32>
    %18 = arith.extui %17 : vector<8x24xi1> to vector<8x24xi32>
    %19 = arith.sitofp %18 : vector<8x24xi32> to vector<8x24xf32>
    %20 = arith.addf %14, %19 : vector<8x24xf32>
    %c0_1 = arith.constant 0 : index
    %c0_2 = arith.constant 0 : index
    %21 = vector.load %arg3[%c0_1, %c0_2] : memref<24x128xf32, #tpu.memory_space<vmem>>, vector<24x128xf32>
    %cst_3 = arith.constant dense<0.000000e+00> : vector<8x128xf32>
    %22 = tpu.matmul %20, %21, %cst_3 {dimension_numbers = #tpu.dot_dimension_numbers<[1], [0], [0], [1], [0, 0, 1, 1], [], []>} : vector<8x24xf32>, vector<24x128xf32>, vector<8x128xf32> -> vector<8x128xf32>
    %c0_4 = arith.constant 0 : index
    %c0_5 = arith.constant 0 : index
    %23 = vector.load %arg2[%c0_4, %c0_5] : memref<8x5xf32, #tpu.memory_space<vmem>>, vector<8x5xf32>
    %c0_6 = arith.constant 0 : index
    %c0_7 = arith.constant 0 : index
    %24 = vector.load %arg4[%c0_6, %c0_7] : memref<5x128xf32, #tpu.memory_space<vmem>>, vector<5x128xf32>
    %cst_8 = arith.constant dense<0.000000e+00> : vector<8x128xf32>
    %25 = tpu.matmul %23, %24, %cst_8 {dimension_numbers = #tpu.dot_dimension_numbers<[1], [0], [0], [1], [0, 0, 1, 1], [], []>} : vector<8x5xf32>, vector<5x128xf32>, vector<8x128xf32> -> vector<8x128xf32>
    %26 = arith.addf %22, %25 : vector<8x128xf32>
    %c0_9 = arith.constant 0 : index
    %c0_10 = arith.constant 0 : index
    %27 = vector.load %arg5[%c0_9, %c0_10] : memref<1x128xf32, #tpu.memory_space<vmem>>, vector<1x128xf32>
    %28 = vector.broadcast %27 : vector<1x128xf32> to vector<8x128xf32>
    %29 = arith.addf %26, %28 : vector<8x128xf32>
    %cst_11 = arith.constant 0.000000e+00 : f32
    %30 = vector.broadcast %cst_11 : f32 to vector<8x128xf32>
    %31 = arith.maximumf %29, %30 : vector<8x128xf32>
    %c0_12 = arith.constant 0 : index
    %c0_13 = arith.constant 0 : index
    %32 = vector.load %arg6[%c0_12, %c0_13] : memref<128x128xf32, #tpu.memory_space<vmem>>, vector<128x128xf32>
    %c0_14 = arith.constant 0 : index
    %c0_15 = arith.constant 0 : index
    %33 = vector.load %arg7[%c0_14, %c0_15] : memref<1x128xf32, #tpu.memory_space<vmem>>, vector<1x128xf32>
    %cst_16 = arith.constant dense<0.000000e+00> : vector<8x128xf32>
    %34 = tpu.matmul %31, %32, %cst_16 {dimension_numbers = #tpu.dot_dimension_numbers<[1], [0], [0], [1], [0, 0, 1, 1], [], []>} : vector<8x128xf32>, vector<128x128xf32>, vector<8x128xf32> -> vector<8x128xf32>
    %35 = vector.broadcast %33 : vector<1x128xf32> to vector<8x128xf32>
    %36 = arith.addf %34, %35 : vector<8x128xf32>
    %cst_17 = arith.constant 0.000000e+00 : f32
    %37 = vector.broadcast %cst_17 : f32 to vector<8x128xf32>
    %38 = arith.maximumf %36, %37 : vector<8x128xf32>
    %c0_18 = arith.constant 0 : index
    %c0_19 = arith.constant 0 : index
    %39 = vector.load %arg8[%c0_18, %c0_19] : memref<128x2xf32, #tpu.memory_space<vmem>>, vector<128x2xf32>
    %c0_20 = arith.constant 0 : index
    %c0_21 = arith.constant 0 : index
    %40 = vector.load %arg9[%c0_20, %c0_21] : memref<1x2xf32, #tpu.memory_space<vmem>>, vector<1x2xf32>
    %cst_22 = arith.constant dense<0.000000e+00> : vector<8x2xf32>
    %41 = tpu.matmul %38, %39, %cst_22 {dimension_numbers = #tpu.dot_dimension_numbers<[1], [0], [0], [1], [0, 0, 1, 1], [], []>} : vector<8x128xf32>, vector<128x2xf32>, vector<8x2xf32> -> vector<8x2xf32>
    %42 = vector.broadcast %40 : vector<1x2xf32> to vector<8x2xf32>
    %43 = arith.addf %41, %42 : vector<8x2xf32>
    %c0_23 = arith.constant 0 : index
    %c0_24 = arith.constant 0 : index
    %44 = vector.load %arg10[%c0_23, %c0_24] : memref<8x2xf32, #tpu.memory_space<vmem>>, vector<8x2xf32>
    tpu.vector_store %arg10[%c0_23, %c0_24], %43 {strides = array<i32>} : memref<8x2xf32, #tpu.memory_space<vmem>>, vector<8x2xf32>,
    return
  }
  func.func @transform_0(%arg0: i32) -> (i32, i32) {
    %c0_i32 = arith.constant 0 : i32
    %c0_i32_0 = arith.constant 0 : i32
    return %arg0, %c0_i32 : i32, i32
  }
  func.func @transform_1(%arg0: i32) -> (i32, i32) {
    %c0_i32 = arith.constant 0 : i32
    %c0_i32_0 = arith.constant 0 : i32
    return %arg0, %c0_i32 : i32, i32
  }
  func.func @transform_2(%arg0: i32) -> (i32, i32) {
    %c0_i32 = arith.constant 0 : i32
    %c0_i32_0 = arith.constant 0 : i32
    %c0_i32_1 = arith.constant 0 : i32
    return %c0_i32, %c0_i32_0 : i32, i32
  }
  func.func @transform_3(%arg0: i32) -> (i32, i32) {
    %c0_i32 = arith.constant 0 : i32
    %c0_i32_0 = arith.constant 0 : i32
    %c0_i32_1 = arith.constant 0 : i32
    return %c0_i32, %c0_i32_0 : i32, i32
  }
  func.func @transform_4(%arg0: i32) -> (i32, i32) {
    %c0_i32 = arith.constant 0 : i32
    %c0_i32_0 = arith.constant 0 : i32
    %c0_i32_1 = arith.constant 0 : i32
    return %c0_i32, %c0_i32_0 : i32, i32
  }
  func.func @transform_5(%arg0: i32) -> (i32, i32) {
    %c0_i32 = arith.constant 0 : i32
    %c0_i32_0 = arith.constant 0 : i32
    %c0_i32_1 = arith.constant 0 : i32
    return %c0_i32, %c0_i32_0 : i32, i32
  }
  func.func @transform_6(%arg0: i32) -> (i32, i32) {
    %c0_i32 = arith.constant 0 : i32
    %c0_i32_0 = arith.constant 0 : i32
    %c0_i32_1 = arith.constant 0 : i32
    return %c0_i32, %c0_i32_0 : i32, i32
  }
  func.func @transform_7(%arg0: i32) -> (i32, i32) {
    %c0_i32 = arith.constant 0 : i32
    %c0_i32_0 = arith.constant 0 : i32
    %c0_i32_1 = arith.constant 0 : i32
    return %c0_i32, %c0_i32_0 : i32, i32
  }
  func.func @transform_8(%arg0: i32) -> (i32, i32) {
    %c0_i32 = arith.constant 0 : i32
    %c0_i32_0 = arith.constant 0 : i32
    %c0_i32_1 = arith.constant 0 : i32
    return %c0_i32, %c0_i32_0 : i32, i32
  }
  func.func @transform_9(%arg0: i32) -> (i32, i32) {
    %c0_i32 = arith.constant 0 : i32
    %c0_i32_0 = arith.constant 0 : i32
    return %arg0, %c0_i32 : i32, i32
  }
}

module attributes {stable_mosaic.version = 11 : i64} {
  func.func @_tabular_kernel(%arg0: i32, %arg1: memref<8x3xi32, #tpu.memory_space<vmem>>, %arg2: memref<8x5xf32, #tpu.memory_space<vmem>>, %arg3: memref<24x128xf32, #tpu.memory_space<vmem>>, %arg4: memref<5x128xf32, #tpu.memory_space<vmem>>, %arg5: memref<1x128xf32, #tpu.memory_space<vmem>>, %arg6: memref<128x128xf32, #tpu.memory_space<vmem>>, %arg7: memref<1x128xf32, #tpu.memory_space<vmem>>, %arg8: memref<128x2xf32, #tpu.memory_space<vmem>>, %arg9: memref<1x2xf32, #tpu.memory_space<vmem>>, %arg10: memref<8x2xf32, #tpu.memory_space<vmem>>) attributes {dimension_semantics = [#tpu.dimension_semantics<parallel>], iteration_bounds = array<i64: 1>, scalar_prefetch = 0 : i64, scratch_operands = 0 : i64, tpu.core_type = #tpu.core_type<tc>, window_params = [{transform_indices = @transform_0, window_bounds = array<i64: 8, 3>}, {transform_indices = @transform_1, window_bounds = array<i64: 8, 5>}, {pipeline_mode = #tpu.pipeline_mode<synchronous>, transform_indices = @transform_2, window_bounds = array<i64: 24, 128>}, {pipeline_mode = #tpu.pipeline_mode<synchronous>, transform_indices = @transform_3, window_bounds = array<i64: 5, 128>}, {pipeline_mode = #tpu.pipeline_mode<synchronous>, transform_indices = @transform_4, window_bounds = array<i64: 1, 128>}, {pipeline_mode = #tpu.pipeline_mode<synchronous>, transform_indices = @transform_5, window_bounds = array<i64: 128, 128>}, {pipeline_mode = #tpu.pipeline_mode<synchronous>, transform_indices = @transform_6, window_bounds = array<i64: 1, 128>}, {pipeline_mode = #tpu.pipeline_mode<synchronous>, transform_indices = @transform_7, window_bounds = array<i64: 128, 2>}, {pipeline_mode = #tpu.pipeline_mode<synchronous>, transform_indices = @transform_8, window_bounds = array<i64: 1, 2>}, {transform_indices = @transform_9, window_bounds = array<i64: 8, 2>}]} {
    %c0 = arith.constant 0 : index
    %c0_0 = arith.constant 0 : index
    %0 = vector.load %arg1[%c0, %c0_0] : memref<8x3xi32, #tpu.memory_space<vmem>>, vector<8x3xi32>
    %1 = tpu.iota {dimensions = array<i32: 1>} : vector<8x24xi32>
    %cst = arith.constant 0.000000e+00 : f32
    %2 = vector.broadcast %cst : f32 to vector<8x24xf32>
    %3 = vector.extract_strided_slice %0 {offsets = [0, 0], sizes = [8, 1], strides = [1, 1]} : vector<8x3xi32> to vector<8x1xi32>
    %4 = vector.broadcast %3 : vector<8x1xi32> to vector<8x24xi32>
    %5 = arith.cmpi eq, %4, %1 : vector<8x24xi32>
    %6 = arith.extui %5 : vector<8x24xi1> to vector<8x24xi32>
    %7 = arith.sitofp %6 : vector<8x24xi32> to vector<8x24xf32>
    %8 = arith.addf %2, %7 : vector<8x24xf32>
    %9 = vector.extract_strided_slice %0 {offsets = [0, 1], sizes = [8, 1], strides = [1, 1]} : vector<8x3xi32> to vector<8x1xi32>
    %10 = vector.broadcast %9 : vector<8x1xi32> to vector<8x24xi32>
    %11 = arith.cmpi eq, %10, %1 : vector<8x24xi32>
    %12 = arith.extui %11 : vector<8x24xi1> to vector<8x24xi32>
    %13 = arith.sitofp %12 : vector<8x24xi32> to vector<8x24xf32>
    %14 = arith.addf %8, %13 : vector<8x24xf32>
    %15 = vector.extract_strided_slice %0 {offsets = [0, 2], sizes = [8, 1], strides = [1, 1]} : vector<8x3xi32> to vector<8x1xi32>
    %16 = vector.broadcast %15 : vector<8x1xi32> to vector<8x24xi32>
    %17 = arith.cmpi eq, %16, %1 : vector<8x24xi32>
    %18 = arith.extui %17 : vector<8x24xi1> to vector<8x24xi32>
    %19 = arith.sitofp %18 : vector<8x24xi32> to vector<8x24xf32>
    %20 = arith.addf %14, %19 : vector<8x24xf32>
    %c0_1 = arith.constant 0 : index
    %c0_2 = arith.constant 0 : index
    %21 = vector.load %arg3[%c0_1, %c0_2] : memref<24x128xf32, #tpu.memory_space<vmem>>, vector<24x128xf32>
    %cst_3 = arith.constant dense<0.000000e+00> : vector<8x128xf32>
    %22 = tpu.matmul %20, %21, %cst_3 {dimension_numbers = #tpu.dot_dimension_numbers<[1], [0], [0], [1], [0, 0, 1, 1], [], []>} : vector<8x24xf32>, vector<24x128xf32>, vector<8x128xf32> -> vector<8x128xf32>
    %c0_4 = arith.constant 0 : index
    %c0_5 = arith.constant 0 : index
    %23 = vector.load %arg2[%c0_4, %c0_5] : memref<8x5xf32, #tpu.memory_space<vmem>>, vector<8x5xf32>
    %c0_6 = arith.constant 0 : index
    %c0_7 = arith.constant 0 : index
    %24 = vector.load %arg4[%c0_6, %c0_7] : memref<5x128xf32, #tpu.memory_space<vmem>>, vector<5x128xf32>
    %cst_8 = arith.constant dense<0.000000e+00> : vector<8x128xf32>
    %25 = tpu.matmul %23, %24, %cst_8 {dimension_numbers = #tpu.dot_dimension_numbers<[1], [0], [0], [1], [0, 0, 1, 1], [], []>} : vector<8x5xf32>, vector<5x128xf32>, vector<8x128xf32> -> vector<8x128xf32>
    %26 = arith.addf %22, %25 : vector<8x128xf32>
    %c0_9 = arith.constant 0 : index
    %c0_10 = arith.constant 0 : index
    %27 = vector.load %arg5[%c0_9, %c0_10] : memref<1x128xf32, #tpu.memory_space<vmem>>, vector<1x128xf32>
    %28 = vector.broadcast %27 : vector<1x128xf32> to vector<8x128xf32>
    %29 = arith.addf %26, %28 : vector<8x128xf32>
    %cst_11 = arith.constant 0.000000e+00 : f32
    %30 = vector.broadcast %cst_11 : f32 to vector<8x128xf32>
    %31 = arith.maximumf %29, %30 : vector<8x128xf32>
    %c0_12 = arith.constant 0 : index
    %c0_13 = arith.constant 0 : index
    %32 = vector.load %arg6[%c0_12, %c0_13] : memref<128x128xf32, #tpu.memory_space<vmem>>, vector<128x128xf32>
    %c0_14 = arith.constant 0 : index
    %c0_15 = arith.constant 0 : index
    %33 = vector.load %arg7[%c0_14, %c0_15] : memref<1x128xf32, #tpu.memory_space<vmem>>, vector<1x128xf32>
    %cst_16 = arith.constant dense<0.000000e+00> : vector<8x128xf32>
    %34 = tpu.matmul %31, %32, %cst_16 {dimension_numbers = #tpu.dot_dimension_numbers<[1], [0], [0], [1], [0, 0, 1, 1], [], []>} : vector<8x128xf32>, vector<128x128xf32>, vector<8x128xf32> -> vector<8x128xf32>
    %35 = vector.broadcast %33 : vector<1x128xf32> to vector<8x128xf32>
    %36 = arith.addf %34, %35 : vector<8x128xf32>
    %cst_17 = arith.constant 0.000000e+00 : f32
    %37 = vector.broadcast %cst_17 : f32 to vector<8x128xf32>
    %38 = arith.maximumf %36, %37 : vector<8x128xf32>
    %c0_18 = arith.constant 0 : index
    %c0_19 = arith.constant 0 : index
    %39 = vector.load %arg8[%c0_18, %c0_19] : memref<128x2xf32, #tpu.memory_space<vmem>>, vector<128x2xf32>
    %c0_20 = arith.constant 0 : index
    %c0_21 = arith.constant 0 : index
    %40 = vector.load %arg9[%c0_20, %c0_21] : memref<1x2xf32, #tpu.memory_space<vmem>>, vector<1x2xf32>
    %cst_22 = arith.constant dense<0.000000e+00> : vector<8x2xf32>
    %41 = tpu.matmul %38, %39, %cst_22 {dimension_numbers = #tpu.dot_dimension_numbers<[1], [0], [0], [1], [0, 0, 1, 1], [], []>} : vector<8x128xf32>, vector<128x2xf32>, vector<8x2xf32> -> vector<8x2xf32>
    %42 = vector.broadcast %40 : vector<1x2xf32> to vector<8x2xf32>
    %43 = arith.addf %41, %42 : vector<8x2xf32>
    %c0_23 = arith.constant 0 : index
    %c0_24 = arith.constant 0 : index
    %44 = vector.load %arg10[%c0_23, %c0_24] : memref<8x2xf32, #tpu.memory_space<vmem>>, vector<8x2xf32>
    tpu.vector_store %arg10[%c0_23, %c0_24], %43 {strides = array<i32>} : memref<8x2xf32, #tpu.memory_space<vmem>>, vector<8x2xf32>,
    return
  }
  func.func @transform_0(%arg0: i32) -> (i32, i32) {
    %c0_i32 = arith.constant 0 : i32
    %c0_i32_0 = arith.constant 0 : i32
    return %arg0, %c0_i32 : i32, i32
  }
  func.func @transform_1(%arg0: i32) -> (i32, i32) {
    %c0_i32 = arith.constant 0 : i32
    %c0_i32_0 = arith.constant 0 : i32
    return %arg0, %c0_i32 : i32, i32
  }
  func.func @transform_2(%arg0: i32) -> (i32, i32) {
    %c0_i32 = arith.constant 0 : i32
    %c0_i32_0 = arith.constant 0 : i32
    %c0_i32_1 = arith.constant 0 : i32
    return %c0_i32, %c0_i32_0 : i32, i32
  }
  func.func @transform_3(%arg0: i32) -> (i32, i32) {
    %c0_i32 = arith.constant 0 : i32
    %c0_i32_0 = arith.constant 0 : i32
    %c0_i32_1 = arith.constant 0 : i32
    return %c0_i32, %c0_i32_0 : i32, i32
  }
  func.func @transform_4(%arg0: i32) -> (i32, i32) {
    %c0_i32 = arith.constant 0 : i32
    %c0_i32_0 = arith.constant 0 : i32
    %c0_i32_1 = arith.constant 0 : i32
    return %c0_i32, %c0_i32_0 : i32, i32
  }
  func.func @transform_5(%arg0: i32) -> (i32, i32) {
    %c0_i32 = arith.constant 0 : i32
    %c0_i32_0 = arith.constant 0 : i32
    %c0_i32_1 = arith.constant 0 : i32
    return %c0_i32, %c0_i32_0 : i32, i32
  }
  func.func @transform_6(%arg0: i32) -> (i32, i32) {
    %c0_i32 = arith.constant 0 : i32
    %c0_i32_0 = arith.constant 0 : i32
    %c0_i32_1 = arith.constant 0 : i32
    return %c0_i32, %c0_i32_0 : i32, i32
  }
  func.func @transform_7(%arg0: i32) -> (i32, i32) {
    %c0_i32 = arith.constant 0 : i32
    %c0_i32_0 = arith.constant 0 : i32
    %c0_i32_1 = arith.constant 0 : i32
    return %c0_i32, %c0_i32_0 : i32, i32
  }
  func.func @transform_8(%arg0: i32) -> (i32, i32) {
    %c0_i32 = arith.constant 0 : i32
    %c0_i32_0 = arith.constant 0 : i32
    %c0_i32_1 = arith.constant 0 : i32
    return %c0_i32, %c0_i32_0 : i32, i32
  }
  func.func @transform_9(%arg0: i32) -> (i32, i32) {
    %c0_i32 = arith.constant 0 : i32
    %c0_i32_0 = arith.constant 0 : i32
    return %arg0, %c0_i32 : i32, i32
  }
}

</mosaic_0001>

<bundles_post_ra>
// kernel: tpu_custom_call.1
= control target key start
LH: loop header
LB: loop body
LE: loop exit
PB: predicated region body
PF: predicated region fallthrough
CT: control target
= control target key end

     0   :  { %14 = vsyncpa [#allocation3], 0  ;;  %s597_s30 = smov [#allocation2]   ;;  %s822_s0 = inlined_call_operand.vmem [shape: s32[8,3], index: 0, kind: input, shape index: {}]   ;;  %s823_s1 = inlined_call_operand.vmem [shape: f32[8,5], index: 1, kind: input, shape index: {}]   ;;  %s824_s2 = inlined_call_operand.hbm [shape: f32[24,128], index: 2, kind: input, shape index: {}]   ;;  %s825_s3 = inlined_call_operand.vmem [shape: f32[5,128], index: 3, kind: input, shape index: {}]   ;;  %s826_s4 = inlined_call_operand.vmem [shape: f32[1,128], index: 4, kind: input, shape index: {}]   ;;  %s827_s5 = inlined_call_operand.vmem [shape: f32[128,128], index: 5, kind: input, shape index: {}]   ;;  %s828_s6 = inlined_call_operand.vmem [shape: f32[1,128], index: 6, kind: input, shape index: {}]   ;;  %s829_s7 = inlined_call_operand.vmem [shape: f32[128,2], index: 7, kind: input, shape index: {}]   ;;  %s830_s8 = inlined_call_operand.vmem [shape: f32[1,2], index: 8, kind: input, shape index: {}]   ;;  %s831_s9 = inlined_call_operand.vmem [shape: f32[8,2], index: 9, kind: output, shape index: {}]  }
   0x1   :  { %s24_s10 = sshll.u32 %s597_s30, 4  ;;  %s25_s10 = int_to_ptr.vmem [resolvable:$true] %s24_s10 }
   0x2   :  { %s583_s11 = scalar_lea.vmem %s25_s10, 384  ;;  %p588_p1 = scmp.lt.s32.totalorder %s25_s10, %s25_s10 }
   0x3   :  { %p584_p0 = scmp.ne.s32.totalorder %s25_s10, %s583_s11  ;;  %p589_p2 = scmp.lt.s32.totalorder %s583_s11, %s583_s11 }
   0x5   :  { %p590_p3 = por %p589_p2, %p588_p1 }
   0x7   :  { %p591_p4 = pnand %p590_p3, %p584_p0 }
   0x9   :  { %594 = shalt.err (!%p591_p4)
}
   0xa   :  { %s598_s12 = smov 128   ;;  %s599_s13 = smov 8  }
   0xb   :  { %30 = dma.hbm_to_vmem [thread:$0]  %s824_s2, 384, %s25_s10, [#allocation3], %s598_s12, %s598_s12, %s599_s13  }
   0xc   :  { %595 = dma.done.wait [#allocation3], 384  }
   0xd   :  { %596 = vsyncadd [#allocation3], 4294966912  ;;  %v600_v0 = vmov 0   ;;  %v601_v1 = vmov 2   ;;  %v602_v2 = vmov 0.0   ;;  %v46_v3 = vld [vmem:[%s822_s0] sm:$0xff]  ;;  %v47_v22 = vlaneseq }
   0xe   :  { %571 = vset.pattern.permute.xlu0 %v600_v0  ;;  %573 = vset.pattern.permute.xlu1 %v601_v1  ;;  %v72_v4 = vld [vmem:[#allocation2 + $0x10] sm:$0xff]  ;;  %v74_v5 = vld [vmem:[%s825_s3] sm:$0x1f]  ;;  %vm79_vm0 = vcmask 1044480   ;;  %v71_v6 = vld [vmem:[#allocation2 + $0x8] sm:$0xff]  ;;  %v603_v7 = vmov 1  }
   0xf   :  { %484 = vmatprep.subr.mxu1 %v602_v2  ;;  %479 = vmatprep.subr.mxu0 %v602_v2  ;;  %v73_v8 = vld [vmem:[%s823_s1] sm:$0xff]  ;;  %vm75_vm1 = vcmask 39936   ;;  %vm604_vm2 = vmmov 0   ;;  %v251_v10 = vld [vmem:[%s827_s5 + $0x78] sm:$0xff]  ;;  %v250_v11 = vld [vmem:[%s827_s5 + $0x70] sm:$0xff]  ;;  %v48_v23 = vand.u32 127, %v47_v22 }
  0x10   :  { %50 = vperm.xlu0 %571, %v46_v3   ;;  %64 = vperm.xlu1 %573, %v46_v3   ;;  %v70_v9 = vld [vmem:[#allocation2] sm:$0xff]  ;;  %v249_v12 = vld [vmem:[%s827_s5 + $0x68] sm:$0xff]  ;;  %v247_v14 = vld [vmem:[%s827_s5 + $0x58] sm:$0xff]  ;;  %vm153_vm6 = vcmask 195584   ;;  %vm423_vm7 = vcmask 15360  }
  0x11   :  { %485 = vmatpush3.msra.mxu1 %v72_v4  ;;  %480 = vmatpush3.msk.msra.mxu0 %vm79_vm0, %v74_v5  ;;  %v248_v13 = vld [vmem:[%s827_s5 + $0x60] sm:$0xff]  ;;  %v246_v15 = vld [vmem:[%s827_s5 + $0x50] sm:$0xff]  ;;  %v245_v16 = vld [vmem:[%s827_s5 + $0x48] sm:$0xff] }
  0x12   :  { %486 = vmatprep.subr.mxu1 %v602_v2  ;;  %481 = vmatprep.mubr.msk.f32.mxu0 %vm604_vm2, %v602_v2  ;;  %v244_v17 = vld [vmem:[%s827_s5 + $0x40] sm:$0xff]  ;;  %v243_v18 = vld [vmem:[%s827_s5 + $0x38] sm:$0xff]  ;;  %v242_v19 = vld [vmem:[%s827_s5 + $0x30] sm:$0xff] }
  0x13   :  { %487 = vmatpush3.msra.mxu1 %v71_v6  ;;  %482 = vmatmul.mubr.msk.f32.vlgmr.msra.gmra.mxu0 %vm75_vm1, %v73_v8  ;;  %v241_v20 = vld [vmem:[%s827_s5 + $0x28] sm:$0xff]  ;;  %v240_v21 = vld [vmem:[%s827_s5 + $0x20] sm:$0xff]  ;;  %v239_v33 = vld [vmem:[%s827_s5 + $0x18] sm:$0xff] }
  0x14   :  { %572 = vset.pattern.permute.xlu0 %v603_v7  ;;  %488 = vmatprep.subr.mxu1 %v602_v2  ;;  %v238_v35 = vld [vmem:[%s827_s5 + $0x10] sm:$0xff]  ;;  %v237_v36 = vld [vmem:[%s827_s5 + $0x8] sm:$0xff]  ;;  %v236_v37 = vld [vmem:[%s827_s5] sm:$0xff] }
  0x15   :  { %57 = vperm.xlu0 %572, %v46_v3   ;;  %490 = vmatprep.mubr.msk.f32.mxu1 %vm604_vm2, %v602_v2  ;;  %v345_v38 = vld [vmem:[%s829_s7 + $0x78] sm:$0xff]  ;;  %v344_v39 = vld [vmem:[%s829_s7 + $0x70] sm:$0xff]  ;;  %v343_v40 = vld [vmem:[%s829_s7 + $0x68] sm:$0xff] }
  0x16   :  { %489 = vmatpush3.msra.mxu1 %v70_v9  ;;  %493 = vmatprep.subr.mxu0 %v602_v2  ;;  %v342_v41 = vld [vmem:[%s829_s7 + $0x60] sm:$0xff]  ;;  %v341_v42 = vld [vmem:[%s829_s7 + $0x58] sm:$0xff]  ;;  %v340_v43 = vld [vmem:[%s829_s7 + $0x50] sm:$0xff] }
  0x17   :  { %494 = vmatpush3.msra.mxu0 %v251_v10  ;;  %525 = vmatprep.mubr.msk.f32.mxu0 %vm604_vm2, %v602_v2  ;;  %v339_v44 = vld [vmem:[%s829_s7 + $0x48] sm:$0xff]  ;;  %v338_v45 = vld [vmem:[%s829_s7 + $0x40] sm:$0xff]  ;;  %v337_v46 = vld [vmem:[%s829_s7 + $0x38] sm:$0xff] }
  0x18   :  { %495 = vmatprep.subr.mxu0 %v602_v2  ;;  %528 = vmatprep.subr.mxu1 %v602_v2  ;;  %v336_v47 = vld [vmem:[%s829_s7 + $0x30] sm:$0xff]  ;;  %v335_v48 = vld [vmem:[%s829_s7 + $0x28] sm:$0xff]  ;;  %v334_v49 = vld [vmem:[%s829_s7 + $0x20] sm:$0xff] }
  0x19   :  { %496 = vmatpush3.msra.mxu0 %v250_v11  ;;  %574 = vset.pattern.permute.xlu0 %v601_v1  ;;  %v333_v50 = vld [vmem:[%s829_s7 + $0x18] sm:$0xff]  ;;  %v436_v52 = vld [vmem:[%s826_s4] ss:$0 sm:$0xff]  ;;  %v332_v57 = vld [vmem:[%s829_s7 + $0x10] sm:$0xff] }
  0x1a   :  { %497 = vmatprep.subr.mxu0 %v602_v2  ;;  %v331_v58 = vld [vmem:[%s829_s7 + $0x8] sm:$0xff]  ;;  %v330_v59 = vld [vmem:[%s829_s7] sm:$0xff] }
  0x1b   :  { %498 = vmatpush3.msra.mxu0 %v249_v12  ;;  %v437_v60 = vld [vmem:[%s828_s6] ss:$0 sm:$0xff] }
  0x1c   :  { %499 = vmatprep.subr.mxu0 %v602_v2  ;;  %v438_v1 = vld [vmem:[%s830_s8] ss:$0 sm:$0xff] }
  0x1d   :  { %500 = vmatpush3.msra.mxu0 %v248_v13 }
  0x1e   :  { %501 = vmatprep.subr.mxu0 %v602_v2 }
  0x1f   :  { %502 = vmatpush3.msra.mxu0 %v247_v14 }
  0x20   :  { %503 = vmatprep.subr.mxu0 %v602_v2 }
  0x21   :  { %504 = vmatpush3.msra.mxu0 %v246_v15 }
  0x22   :  { %505 = vmatprep.subr.mxu0 %v602_v2 }
  0x23   :  { %506 = vmatpush3.msra.mxu0 %v245_v16 }
  0x24   :  { %507 = vmatprep.subr.mxu0 %v602_v2 }
  0x25   :  { %508 = vmatpush3.msra.mxu0 %v244_v17 }
  0x26   :  { %509 = vmatprep.subr.mxu0 %v602_v2 }
  0x27   :  { %510 = vmatpush3.msra.mxu0 %v243_v18 }
  0x28   :  { %511 = vmatprep.subr.mxu0 %v602_v2 }
  0x29   :  { %512 = vmatpush3.msra.mxu0 %v242_v19 }
  0x2a   :  { %513 = vmatprep.subr.mxu0 %v602_v2 }
  0x2b   :  { %514 = vmatpush3.msra.mxu0 %v241_v20 }
  0x2c   :  { %515 = vmatprep.subr.mxu0 %v602_v2 }
  0x2d   :  { %516 = vmatpush3.msra.mxu0 %v240_v21 }
  0x2e   :  { %517 = vmatprep.subr.mxu0 %v602_v2 }
  0x2f   :  { %518 = vmatpush3.msra.mxu0 %v239_v33 }
  0x30   :  { %519 = vmatprep.subr.mxu0 %v602_v2 }
  0x31   :  { %520 = vmatpush3.msra.mxu0 %v238_v35 }
  0x32   :  { %521 = vmatprep.subr.mxu0 %v602_v2 }
  0x33   :  { %522 = vmatpush3.msra.mxu0 %v237_v36 }
  0x34   :  { %523 = vmatprep.subr.mxu0 %v602_v2 }
  0x35   :  { %524 = vmatpush3.msra.mxu0 %v236_v37 }
  0x8b   :  { %v51_v24 = vpop.permute.xlu0 %50  ;;  %v65_v25 = vpop.permute.xlu1 %64 }
  0x8c   :  { %vm52_vm3 = vcmp.eq.s32.totalorder %v51_v24, %v48_v23  ;;  %vm66_vm4 = vcmp.eq.s32.totalorder %v65_v25, %v48_v23 }
  0x8d   :  { %v430_v27 = vsel %vm52_vm3, 1.0, %v602_v2  ;;  %v432_v29 = vsel %vm66_vm4, 1.0, %v602_v2 }
  0x90   :  { %v58_v26 = vpop.permute.xlu0 %57 }
  0x91   :  { %vm59_vm5 = vcmp.eq.s32.totalorder %v58_v26, %v48_v23 }
  0x92   :  { %v431_v28 = vsel %vm59_vm5, 1.0, %v602_v2 }
  0x93   :  { %v62_v30 = vadd.f32 %v431_v28, %v430_v27 }
  0x95   :  { %v69_v31 = vadd.f32 %v432_v29, %v62_v30 }
  0x97   :  { %491 = vmatmul.mubr.msk.f32.vlgmr.msra.gmra.mxu1 %vm153_vm6, %v69_v31 }
  0x98   :  { %560 = vmatprep.mubr.msk.f32.mxu1 %vm604_vm2, %v602_v2  ;;  %529 = vmatpush3.msra.mxu1 %v345_v38 }
  0x99   :  { %530 = vmatprep.subr.mxu1 %v602_v2 }
  0x9a   :  { %531 = vmatpush3.msra.mxu1 %v344_v39 }
  0x9b   :  { %532 = vmatprep.subr.mxu1 %v602_v2 }
  0x9c   :  { %533 = vmatpush3.msra.mxu1 %v343_v40 }
  0x9d   :  { %534 = vmatprep.subr.mxu1 %v602_v2 }
  0x9e   :  { %535 = vmatpush3.msra.mxu1 %v342_v41 }
  0x9f   :  { %536 = vmatprep.subr.mxu1 %v602_v2 }
  0xa0   :  { %537 = vmatpush3.msra.mxu1 %v341_v42 }
  0xa1   :  { %538 = vmatprep.subr.mxu1 %v602_v2 }
  0xa2   :  { %539 = vmatpush3.msra.mxu1 %v340_v43 }
  0xa3   :  { %540 = vmatprep.subr.mxu1 %v602_v2 }
  0xa4   :  { %541 = vmatpush3.msra.mxu1 %v339_v44 }
  0xa5   :  { %542 = vmatprep.subr.mxu1 %v602_v2 }
  0xa6   :  { %543 = vmatpush3.msra.mxu1 %v338_v45 }
  0xa7   :  { %544 = vmatprep.subr.mxu1 %v602_v2 }
  0xa8   :  { %545 = vmatpush3.msra.mxu1 %v337_v46 }
  0xa9   :  { %546 = vmatprep.subr.mxu1 %v602_v2 }
  0xaa   :  { %547 = vmatpush3.msra.mxu1 %v336_v47 }
  0xab   :  { %548 = vmatprep.subr.mxu1 %v602_v2 }
  0xac   :  { %549 = vmatpush3.msra.mxu1 %v335_v48 }
  0xad   :  { %550 = vmatprep.subr.mxu1 %v602_v2 }
  0xae   :  { %551 = vmatpush3.msra.mxu1 %v334_v49 }
  0xaf   :  { %552 = vmatprep.subr.mxu1 %v602_v2 }
  0xb0   :  { %553 = vmatpush3.msra.mxu1 %v333_v50 }
  0xb1   :  { %554 = vmatprep.subr.mxu1 %v602_v2 }
  0xb2   :  { %555 = vmatpush3.msra.mxu1 %v332_v57 }
  0xb3   :  { %556 = vmatprep.subr.mxu1 %v602_v2 }
  0xb4   :  { %557 = vmatpush3.msra.mxu1 %v331_v58 }
  0xb5   :  { %558 = vmatprep.subr.mxu1 %v602_v2 }
  0xb6   :  { %559 = vmatpush3.msra.mxu1 %v330_v59 }
  0xd3   :  { %v149_v32 = vpop.f32.mrf.mxu0 }
  0xd5   :  { %v483_v34 = vpop.f32.mrf.mxu0 }
 0x157   :  { %v223_v51 = vpop.f32.mrf.mxu1 }
 0x158   :  { %v224_v53 = vadd.f32 %v223_v51, %v149_v32 }
 0x159   :  { %v492_v54 = vpop.f32.mrf.mxu1 }
 0x15a   :  { %v234_v55 = vadd.f32 %v436_v52, %v224_v53 }
 0x15c   :  { %v235_v56 = vmax.f32 %v234_v55, 0.0 }
 0x15e   :  { %526 = vmatmul.mubr.f32.vlgmr.msra.gmra.mxu0 %v235_v56 }
 0x21e   :  { %v325_v61 = vpop.f32.mrf.mxu0 }
 0x21f   :  { %v326_v62 = vadd.f32 %v437_v60, %v325_v61 }
 0x220   :  { %v527_v63 = vpop.f32.mrf.mxu0 }
 0x221   :  { %v329_v0 = vmax.f32 %v326_v62, 0.0 }
 0x223   :  { %561 = vmatmul.mubr.f32.vlgmr.msra.gmra.mxu1 %v329_v0 }
 0x2e3   :  { %v419_v3 = vpop.f32.mrf.mxu1 }
 0x2e4   :  { %v420_v2 = vadd.f32 %v438_v1, %v419_v3 }
 0x2e5   :  { %v562_v4 = vpop.f32.mrf.mxu1 }
 0x2e6   :  { %424 = vst.msk [vmem:[%s831_s9] sm:$0xff] %vm423_vm7, %v420_v2 }
 0x2e7   :  { %429 = vsyncpa [#allocation3], 1 }

// kernel: tpu_custom_call.1
= control target key start
LH: loop header
LB: loop body
LE: loop exit
PB: predicated region body
PF: predicated region fallthrough
CT: control target
= control target key end

     0   :  { %14 = vsyncpa [#allocation3], 0  ;;  %s597_s30 = smov [#allocation2]   ;;  %s822_s0 = inlined_call_operand.vmem [shape: s32[8,3], index: 0, kind: input, shape index: {}]   ;;  %s823_s1 = inlined_call_operand.vmem [shape: f32[8,5], index: 1, kind: input, shape index: {}]   ;;  %s824_s2 = inlined_call_operand.hbm [shape: f32[24,128], index: 2, kind: input, shape index: {}]   ;;  %s825_s3 = inlined_call_operand.vmem [shape: f32[5,128], index: 3, kind: input, shape index: {}]   ;;  %s826_s4 = inlined_call_operand.vmem [shape: f32[1,128], index: 4, kind: input, shape index: {}]   ;;  %s827_s5 = inlined_call_operand.vmem [shape: f32[128,128], index: 5, kind: input, shape index: {}]   ;;  %s828_s6 = inlined_call_operand.vmem [shape: f32[1,128], index: 6, kind: input, shape index: {}]   ;;  %s829_s7 = inlined_call_operand.vmem [shape: f32[128,2], index: 7, kind: input, shape index: {}]   ;;  %s830_s8 = inlined_call_operand.vmem [shape: f32[1,2], index: 8, kind: input, shape index: {}]   ;;  %s831_s9 = inlined_call_operand.vmem [shape: f32[8,2], index: 9, kind: output, shape index: {}]  }
   0x1   :  { %s24_s10 = sshll.u32 %s597_s30, 4  ;;  %s25_s10 = int_to_ptr.vmem [resolvable:$true] %s24_s10 }
   0x2   :  { %s583_s11 = scalar_lea.vmem %s25_s10, 384  ;;  %p588_p1 = scmp.lt.s32.totalorder %s25_s10, %s25_s10 }
   0x3   :  { %p584_p0 = scmp.ne.s32.totalorder %s25_s10, %s583_s11  ;;  %p589_p2 = scmp.lt.s32.totalorder %s583_s11, %s583_s11 }
   0x5   :  { %p590_p3 = por %p589_p2, %p588_p1 }
   0x7   :  { %p591_p4 = pnand %p590_p3, %p584_p0 }
   0x9   :  { %594 = shalt.err (!%p591_p4)
}
   0xa   :  { %s598_s12 = smov 128   ;;  %s599_s13 = smov 8  }
   0xb   :  { %30 = dma.hbm_to_vmem [thread:$0]  %s824_s2, 384, %s25_s10, [#allocation3], %s598_s12, %s598_s12, %s599_s13  }
   0xc   :  { %595 = dma.done.wait [#allocation3], 384  }
   0xd   :  { %596 = vsyncadd [#allocation3], 4294966912  ;;  %v600_v0 = vmov 0   ;;  %v601_v1 = vmov 2   ;;  %v602_v2 = vmov 0.0   ;;  %v46_v3 = vld [vmem:[%s822_s0] sm:$0xff]  ;;  %v47_v22 = vlaneseq }
   0xe   :  { %571 = vset.pattern.permute.xlu0 %v600_v0  ;;  %573 = vset.pattern.permute.xlu1 %v601_v1  ;;  %v72_v4 = vld [vmem:[#allocation2 + $0x10] sm:$0xff]  ;;  %v74_v5 = vld [vmem:[%s825_s3] sm:$0x1f]  ;;  %vm79_vm0 = vcmask 1044480   ;;  %v71_v6 = vld [vmem:[#allocation2 + $0x8] sm:$0xff]  ;;  %v603_v7 = vmov 1  }
   0xf   :  { %484 = vmatprep.subr.mxu1 %v602_v2  ;;  %479 = vmatprep.subr.mxu0 %v602_v2  ;;  %v73_v8 = vld [vmem:[%s823_s1] sm:$0xff]  ;;  %vm75_vm1 = vcmask 39936   ;;  %vm604_vm2 = vmmov 0   ;;  %v251_v10 = vld [vmem:[%s827_s5 + $0x78] sm:$0xff]  ;;  %v250_v11 = vld [vmem:[%s827_s5 + $0x70] sm:$0xff]  ;;  %v48_v23 = vand.u32 127, %v47_v22 }
  0x10   :  { %50 = vperm.xlu0 %571, %v46_v3   ;;  %64 = vperm.xlu1 %573, %v46_v3   ;;  %v70_v9 = vld [vmem:[#allocation2] sm:$0xff]  ;;  %v249_v12 = vld [vmem:[%s827_s5 + $0x68] sm:$0xff]  ;;  %v247_v14 = vld [vmem:[%s827_s5 + $0x58] sm:$0xff]  ;;  %vm153_vm6 = vcmask 195584   ;;  %vm423_vm7 = vcmask 15360  }
  0x11   :  { %485 = vmatpush3.msra.mxu1 %v72_v4  ;;  %480 = vmatpush3.msk.msra.mxu0 %vm79_vm0, %v74_v5  ;;  %v248_v13 = vld [vmem:[%s827_s5 + $0x60] sm:$0xff]  ;;  %v246_v15 = vld [vmem:[%s827_s5 + $0x50] sm:$0xff]  ;;  %v245_v16 = vld [vmem:[%s827_s5 + $0x48] sm:$0xff] }
  0x12   :  { %486 = vmatprep.subr.mxu1 %v602_v2  ;;  %481 = vmatprep.mubr.msk.f32.mxu0 %vm604_vm2, %v602_v2  ;;  %v244_v17 = vld [vmem:[%s827_s5 + $0x40] sm:$0xff]  ;;  %v243_v18 = vld [vmem:[%s827_s5 + $0x38] sm:$0xff]  ;;  %v242_v19 = vld [vmem:[%s827_s5 + $0x30] sm:$0xff] }
  0x13   :  { %487 = vmatpush3.msra.mxu1 %v71_v6  ;;  %482 = vmatmul.mubr.msk.f32.vlgmr.msra.gmra.mxu0 %vm75_vm1, %v73_v8  ;;  %v241_v20 = vld [vmem:[%s827_s5 + $0x28] sm:$0xff]  ;;  %v240_v21 = vld [vmem:[%s827_s5 + $0x20] sm:$0xff]  ;;  %v239_v33 = vld [vmem:[%s827_s5 + $0x18] sm:$0xff] }
  0x14   :  { %572 = vset.pattern.permute.xlu0 %v603_v7  ;;  %488 = vmatprep.subr.mxu1 %v602_v2  ;;  %v238_v35 = vld [vmem:[%s827_s5 + $0x10] sm:$0xff]  ;;  %v237_v36 = vld [vmem:[%s827_s5 + $0x8] sm:$0xff]  ;;  %v236_v37 = vld [vmem:[%s827_s5] sm:$0xff] }
  0x15   :  { %57 = vperm.xlu0 %572, %v46_v3   ;;  %490 = vmatprep.mubr.msk.f32.mxu1 %vm604_vm2, %v602_v2  ;;  %v345_v38 = vld [vmem:[%s829_s7 + $0x78] sm:$0xff]  ;;  %v344_v39 = vld [vmem:[%s829_s7 + $0x70] sm:$0xff]  ;;  %v343_v40 = vld [vmem:[%s829_s7 + $0x68] sm:$0xff] }
  0x16   :  { %489 = vmatpush3.msra.mxu1 %v70_v9  ;;  %493 = vmatprep.subr.mxu0 %v602_v2  ;;  %v342_v41 = vld [vmem:[%s829_s7 + $0x60] sm:$0xff]  ;;  %v341_v42 = vld [vmem:[%s829_s7 + $0x58] sm:$0xff]  ;;  %v340_v43 = vld [vmem:[%s829_s7 + $0x50] sm:$0xff] }
  0x17   :  { %494 = vmatpush3.msra.mxu0 %v251_v10  ;;  %525 = vmatprep.mubr.msk.f32.mxu0 %vm604_vm2, %v602_v2  ;;  %v339_v44 = vld [vmem:[%s829_s7 + $0x48] sm:$0xff]  ;;  %v338_v45 = vld [vmem:[%s829_s7 + $0x40] sm:$0xff]  ;;  %v337_v46 = vld [vmem:[%s829_s7 + $0x38] sm:$0xff] }
  0x18   :  { %495 = vmatprep.subr.mxu0 %v602_v2  ;;  %528 = vmatprep.subr.mxu1 %v602_v2  ;;  %v336_v47 = vld [vmem:[%s829_s7 + $0x30] sm:$0xff]  ;;  %v335_v48 = vld [vmem:[%s829_s7 + $0x28] sm:$0xff]  ;;  %v334_v49 = vld [vmem:[%s829_s7 + $0x20] sm:$0xff] }
  0x19   :  { %496 = vmatpush3.msra.mxu0 %v250_v11  ;;  %574 = vset.pattern.permute.xlu0 %v601_v1  ;;  %v333_v50 = vld [vmem:[%s829_s7 + $0x18] sm:$0xff]  ;;  %v436_v52 = vld [vmem:[%s826_s4] ss:$0 sm:$0xff]  ;;  %v332_v57 = vld [vmem:[%s829_s7 + $0x10] sm:$0xff] }
  0x1a   :  { %497 = vmatprep.subr.mxu0 %v602_v2  ;;  %v331_v58 = vld [vmem:[%s829_s7 + $0x8] sm:$0xff]  ;;  %v330_v59 = vld [vmem:[%s829_s7] sm:$0xff] }
  0x1b   :  { %498 = vmatpush3.msra.mxu0 %v249_v12  ;;  %v437_v60 = vld [vmem:[%s828_s6] ss:$0 sm:$0xff] }
  0x1c   :  { %499 = vmatprep.subr.mxu0 %v602_v2  ;;  %v438_v1 = vld [vmem:[%s830_s8] ss:$0 sm:$0xff] }
  0x1d   :  { %500 = vmatpush3.msra.mxu0 %v248_v13 }
  0x1e   :  { %501 = vmatprep.subr.mxu0 %v602_v2 }
  0x1f   :  { %502 = vmatpush3.msra.mxu0 %v247_v14 }
  0x20   :  { %503 = vmatprep.subr.mxu0 %v602_v2 }
  0x21   :  { %504 = vmatpush3.msra.mxu0 %v246_v15 }
  0x22   :  { %505 = vmatprep.subr.mxu0 %v602_v2 }
  0x23   :  { %506 = vmatpush3.msra.mxu0 %v245_v16 }
  0x24   :  { %507 = vmatprep.subr.mxu0 %v602_v2 }
  0x25   :  { %508 = vmatpush3.msra.mxu0 %v244_v17 }
  0x26   :  { %509 = vmatprep.subr.mxu0 %v602_v2 }
  0x27   :  { %510 = vmatpush3.msra.mxu0 %v243_v18 }
  0x28   :  { %511 = vmatprep.subr.mxu0 %v602_v2 }
  0x29   :  { %512 = vmatpush3.msra.mxu0 %v242_v19 }
  0x2a   :  { %513 = vmatprep.subr.mxu0 %v602_v2 }
  0x2b   :  { %514 = vmatpush3.msra.mxu0 %v241_v20 }
  0x2c   :  { %515 = vmatprep.subr.mxu0 %v602_v2 }
  0x2d   :  { %516 = vmatpush3.msra.mxu0 %v240_v21 }
  0x2e   :  { %517 = vmatprep.subr.mxu0 %v602_v2 }
  0x2f   :  { %518 = vmatpush3.msra.mxu0 %v239_v33 }
  0x30   :  { %519 = vmatprep.subr.mxu0 %v602_v2 }
  0x31   :  { %520 = vmatpush3.msra.mxu0 %v238_v35 }
  0x32   :  { %521 = vmatprep.subr.mxu0 %v602_v2 }
  0x33   :  { %522 = vmatpush3.msra.mxu0 %v237_v36 }
  0x34   :  { %523 = vmatprep.subr.mxu0 %v602_v2 }
  0x35   :  { %524 = vmatpush3.msra.mxu0 %v236_v37 }
  0x8b   :  { %v51_v24 = vpop.permute.xlu0 %50  ;;  %v65_v25 = vpop.permute.xlu1 %64 }
  0x8c   :  { %vm52_vm3 = vcmp.eq.s32.totalorder %v51_v24, %v48_v23  ;;  %vm66_vm4 = vcmp.eq.s32.totalorder %v65_v25, %v48_v23 }
  0x8d   :  { %v430_v27 = vsel %vm52_vm3, 1.0, %v602_v2  ;;  %v432_v29 = vsel %vm66_vm4, 1.0, %v602_v2 }
  0x90   :  { %v58_v26 = vpop.permute.xlu0 %57 }
  0x91   :  { %vm59_vm5 = vcmp.eq.s32.totalorder %v58_v26, %v48_v23 }
  0x92   :  { %v431_v28 = vsel %vm59_vm5, 1.0, %v602_v2 }
  0x93   :  { %v62_v30 = vadd.f32 %v431_v28, %v430_v27 }
  0x95   :  { %v69_v31 = vadd.f32 %v432_v29, %v62_v30 }
  0x97   :  { %491 = vmatmul.mubr.msk.f32.vlgmr.msra.gmra.mxu1 %vm153_vm6, %v69_v31 }
  0x98   :  { %560 = vmatprep.mubr.msk.f32.mxu1 %vm604_vm2, %v602_v2  ;;  %529 = vmatpush3.msra.mxu1 %v345_v38 }
  0x99   :  { %530 = vmatprep.subr.mxu1 %v602_v2 }
  0x9a   :  { %531 = vmatpush3.msra.mxu1 %v344_v39 }
  0x9b   :  { %532 = vmatprep.subr.mxu1 %v602_v2 }
  0x9c   :  { %533 = vmatpush3.msra.mxu1 %v343_v40 }
  0x9d   :  { %534 = vmatprep.subr.mxu1 %v602_v2 }
  0x9e   :  { %535 = vmatpush3.msra.mxu1 %v342_v41 }
  0x9f   :  { %536 = vmatprep.subr.mxu1 %v602_v2 }
  0xa0   :  { %537 = vmatpush3.msra.mxu1 %v341_v42 }
  0xa1   :  { %538 = vmatprep.subr.mxu1 %v602_v2 }
  0xa2   :  { %539 = vmatpush3.msra.mxu1 %v340_v43 }
  0xa3   :  { %540 = vmatprep.subr.mxu1 %v602_v2 }
  0xa4   :  { %541 = vmatpush3.msra.mxu1 %v339_v44 }
  0xa5   :  { %542 = vmatprep.subr.mxu1 %v602_v2 }
  0xa6   :  { %543 = vmatpush3.msra.mxu1 %v338_v45 }
  0xa7   :  { %544 = vmatprep.subr.mxu1 %v602_v2 }
  0xa8   :  { %545 = vmatpush3.msra.mxu1 %v337_v46 }
  0xa9   :  { %546 = vmatprep.subr.mxu1 %v602_v2 }
  0xaa   :  { %547 = vmatpush3.msra.mxu1 %v336_v47 }
  0xab   :  { %548 = vmatprep.subr.mxu1 %v602_v2 }
  0xac   :  { %549 = vmatpush3.msra.mxu1 %v335_v48 }
  0xad   :  { %550 = vmatprep.subr.mxu1 %v602_v2 }
  0xae   :  { %551 = vmatpush3.msra.mxu1 %v334_v49 }
  0xaf   :  { %552 = vmatprep.subr.mxu1 %v602_v2 }
  0xb0   :  { %553 = vmatpush3.msra.mxu1 %v333_v50 }
  0xb1   :  { %554 = vmatprep.subr.mxu1 %v602_v2 }
  0xb2   :  { %555 = vmatpush3.msra.mxu1 %v332_v57 }
  0xb3   :  { %556 = vmatprep.subr.mxu1 %v602_v2 }
  0xb4   :  { %557 = vmatpush3.msra.mxu1 %v331_v58 }
  0xb5   :  { %558 = vmatprep.subr.mxu1 %v602_v2 }
  0xb6   :  { %559 = vmatpush3.msra.mxu1 %v330_v59 }
  0xd3   :  { %v149_v32 = vpop.f32.mrf.mxu0 }
  0xd5   :  { %v483_v34 = vpop.f32.mrf.mxu0 }
 0x157   :  { %v223_v51 = vpop.f32.mrf.mxu1 }
 0x158   :  { %v224_v53 = vadd.f32 %v223_v51, %v149_v32 }
 0x159   :  { %v492_v54 = vpop.f32.mrf.mxu1 }
 0x15a   :  { %v234_v55 = vadd.f32 %v436_v52, %v224_v53 }
 0x15c   :  { %v235_v56 = vmax.f32 %v234_v55, 0.0 }
 0x15e   :  { %526 = vmatmul.mubr.f32.vlgmr.msra.gmra.mxu0 %v235_v56 }
 0x21e   :  { %v325_v61 = vpop.f32.mrf.mxu0 }
 0x21f   :  { %v326_v62 = vadd.f32 %v437_v60, %v325_v61 }
 0x220   :  { %v527_v63 = vpop.f32.mrf.mxu0 }
 0x221   :  { %v329_v0 = vmax.f32 %v326_v62, 0.0 }
 0x223   :  { %561 = vmatmul.mubr.f32.vlgmr.msra.gmra.mxu1 %v329_v0 }
 0x2e3   :  { %v419_v3 = vpop.f32.mrf.mxu1 }
 0x2e4   :  { %v420_v2 = vadd.f32 %v438_v1, %v419_v3 }
 0x2e5   :  { %v562_v4 = vpop.f32.mrf.mxu1 }
 0x2e6   :  { %424 = vst.msk [vmem:[%s831_s9] sm:$0xff] %vm423_vm7, %v420_v2 }
 0x2e7   :  { %429 = vsyncpa [#allocation3], 1 }

</bundles_post_ra>
